<compile_context>
chip_gen: v7x
topology: tpu7x:2x2x1
jax: 0.10.0
libtpu: 0.0.40
codegen_flags: <defaults>
</compile_context>

<pallas_src>
import functools

import jax
import jax.numpy as jnp
from jax.experimental import pallas as pl
from jax.experimental.pallas import tpu as pltpu


def _round_up(x, m):
    return ((x + m - 1) // m) * m


# ------------------------------ Pallas kernel --------------------------------
def _iterative_kernel(feat_ref, cond_ref, w1f_ref, w1p_ref, b1_ref, w2_ref,
                      b2_ref, params_ref, delta0_ref, *, num_stages):
    # Padded shapes (f32):
    #   feat: (Bp, Fp)   cond: (Bp, Pp)
    #   w1f : (Fp, Hp)   w1p : (Pp, Hp)   b1: (1, Hp)
    #   w2  : (Hp, Pp)   b2  : (1, Pp)
    #   params out: (num_stages, Bp, Pp)  delta0 out: (Bp, Pp)
    w1p = w1p_ref[...]
    w2 = w2_ref[...]
    b2 = b2_ref[...]

    # Loop-invariant: features only enter through the first linear layer, so
    # project them once and reuse across all stages.
    feat_proj = (jnp.dot(feat_ref[...], w1f_ref[...],
                         preferred_element_type=jnp.float32) + b1_ref[...])

    def stage(p):
        # [feat, p] @ W1 + b1 == feat_proj + p @ W1_param   (concat eliminated)
        h = jnp.maximum(
            feat_proj + jnp.dot(p, w1p, preferred_element_type=jnp.float32),
            0.0)
        return jnp.dot(h, w2, preferred_element_type=jnp.float32) + b2

    cond = cond_ref[...]
    delta0 = stage(cond)
    delta0_ref[...] = delta0
    params = cond + delta0
    params_ref[0] = params
    # num_stages is small & static -> unrolled in-kernel loop (single launch).
    for s in range(1, num_stages):
        params = params + stage(params)
        params_ref[s] = params


# ---------------------------- IterativeRegression ----------------------------
def iterative_regression(features, mean_param, w1, b1, w2, b2, num_stages=3,
                         append_params=True, dim=1):
    """Mirrors IterativeRegression.forward (cond=None, inference).
    Returns (parameters, deltas) lists like the PyTorch module."""
    B, F = features.shape
    H = w1.shape[1]
    P = w2.shape[1]
    assert append_params and dim == 1
    assert w1.shape[0] == F + P

    # Lane-dense padding: last dims -> multiples of 128 lanes, rows -> 8 sublanes.
    Bp = _round_up(B, 8)
    Fp = _round_up(F, 128)
    Hp = _round_up(H, 128)
    Pp = _round_up(P, 128)

    def pad2(a, rows, cols):
        return jnp.pad(a, ((0, rows - a.shape[0]), (0, cols - a.shape[1])))

    # Split W1 so the concat([features, params]) never materializes.
    w1_feat, w1_param = w1[:F], w1[F:]

    # cond = mean_param.expand(batch, -1).clone()
    cond = jnp.broadcast_to(mean_param, (B,) + mean_param.shape[1:])

    feat_p = pad2(features, Bp, Fp)
    cond_p = pad2(cond, Bp, Pp)
    w1f_p = pad2(w1_feat, Fp, Hp)
    w1p_p = pad2(w1_param, Pp, Hp)
    b1_p = pad2(b1, 1, Hp)
    w2_p = pad2(w2, Hp, Pp)
    b2_p = pad2(b2, 1, Pp)

    vmem = pl.BlockSpec(memory_space=pltpu.MemorySpace.VMEM)
    params_all, delta0 = pl.pallas_call(
        functools.partial(_iterative_kernel, num_stages=num_stages),
        out_shape=(
            jax.ShapeDtypeStruct((num_stages, Bp, Pp), jnp.float32),
            jax.ShapeDtypeStruct((Bp, Pp), jnp.float32),
        ),
        in_specs=[vmem] * 7,
        out_specs=(vmem, vmem),
    )(feat_p, cond_p, w1f_p, w1p_p, b1_p, w2_p, b2_p)

    parameters = [params_all[s, :B, :P] for s in range(num_stages)]
    # The reference module only records the first-stage delta.
    deltas = [delta0[:B, :P]]
    return parameters, deltas


# ----------------------- Pure-JAX reference (no Pallas) ----------------------
def _mlp_ref(x, w1, b1, w2, b2):
    h = jnp.maximum(x @ w1 + b1, 0.0)
    return h @ w2 + b2


def _iterative_ref(features, mean_param, w1, b1, w2, b2, num_stages=3):
    B = features.shape[0]
    cond = jnp.broadcast_to(mean_param, (B,) + mean_param.shape[1:])
    x = jnp.concatenate([features, cond], axis=1)
    d0 = _mlp_ref(x, w1, b1, w2, b2)
    deltas = [d0]
    params = [cond[:, : d0.shape[1]] + d0]
    for _ in range(1, num_stages):
        x = jnp.concatenate([features, params[-1]], axis=-1)
        params.append(params[-1] + _mlp_ref(x, w1, b1, w2, b2))
    return params, deltas


if __name__ == "__main__":
    # Small shapes consistent with the module's forward semantics.
    B, F, P, H = 2, 32, 16, 32          # batch, feature dim, param dim, hidden
    num_stages = 3
    in_dim = F + P

    key = jax.random.PRNGKey(0)
    k_feat, k_mean, k_w1, k_b1, k_w2, k_b2 = jax.random.split(key, 6)

    features = jax.random.normal(k_feat, (B, F), dtype=jnp.float32)
    mean_param = 0.1 * jax.random.normal(k_mean, (1, P), dtype=jnp.float32)

    # Deterministic MLP parameter init (synthetic, no checkpoint load).
    w1 = (jax.random.normal(k_w1, (in_dim, H), dtype=jnp.float32)
          / jnp.sqrt(jnp.float32(in_dim)))
    b1 = 0.01 * jax.random.normal(k_b1, (1, H), dtype=jnp.float32)
    w2 = (jax.random.normal(k_w2, (H, P), dtype=jnp.float32)
          / jnp.sqrt(jnp.float32(H)))
    b2 = 0.01 * jax.random.normal(k_b2, (1, P), dtype=jnp.float32)

    params, deltas = iterative_regression(
        features, mean_param, w1, b1, w2, b2, num_stages=num_stages)
    params = [jax.block_until_ready(p) for p in params]
    deltas = [jax.block_until_ready(d) for d in deltas]

    # Correctness against pure-JAX reference.
    ref_params, ref_deltas = _iterative_ref(
        features, mean_param, w1, b1, w2, b2, num_stages=num_stages)
    assert len(params) == num_stages and len(deltas) == 1
    for a, b in zip(params, ref_params):
        assert a.shape == (B, P)
        assert jnp.allclose(a, b, atol=1e-5, rtol=1e-5)
    assert jnp.allclose(deltas[0], ref_deltas[0], atol=1e-5, rtol=1e-5)

    print("KERNEL_OK")
</pallas_src>

<mosaic_0001>
module attributes {stable_mosaic.version = 11 : i64} {
  func.func @_iterative_kernel(%arg0: memref<8x128xf32, #tpu.memory_space<vmem>>, %arg1: memref<8x128xf32, #tpu.memory_space<vmem>>, %arg2: memref<128x128xf32, #tpu.memory_space<vmem>>, %arg3: memref<128x128xf32, #tpu.memory_space<vmem>>, %arg4: memref<1x128xf32, #tpu.memory_space<vmem>>, %arg5: memref<128x128xf32, #tpu.memory_space<vmem>>, %arg6: memref<1x128xf32, #tpu.memory_space<vmem>>, %arg7: memref<3x8x128xf32, #tpu.memory_space<vmem>>, %arg8: memref<8x128xf32, #tpu.memory_space<vmem>>) attributes {dimension_semantics = [], scalar_prefetch = 0 : i64, scratch_operands = 0 : i64, tpu.core_type = #tpu.core_type<tc>} {
    %c0 = arith.constant 0 : index
    %c0_0 = arith.constant 0 : index
    %0 = vector.load %arg3[%c0, %c0_0] : memref<128x128xf32, #tpu.memory_space<vmem>>, vector<128x128xf32>
    %c0_1 = arith.constant 0 : index
    %c0_2 = arith.constant 0 : index
    %1 = vector.load %arg5[%c0_1, %c0_2] : memref<128x128xf32, #tpu.memory_space<vmem>>, vector<128x128xf32>
    %c0_3 = arith.constant 0 : index
    %c0_4 = arith.constant 0 : index
    %2 = vector.load %arg6[%c0_3, %c0_4] : memref<1x128xf32, #tpu.memory_space<vmem>>, vector<1x128xf32>
    %c0_5 = arith.constant 0 : index
    %c0_6 = arith.constant 0 : index
    %3 = vector.load %arg0[%c0_5, %c0_6] : memref<8x128xf32, #tpu.memory_space<vmem>>, vector<8x128xf32>
    %c0_7 = arith.constant 0 : index
    %c0_8 = arith.constant 0 : index
    %4 = vector.load %arg2[%c0_7, %c0_8] : memref<128x128xf32, #tpu.memory_space<vmem>>, vector<128x128xf32>
    %cst = arith.constant dense<0.000000e+00> : vector<8x128xf32>
    %5 = tpu.matmul %3, %4, %cst {dimension_numbers = #tpu.dot_dimension_numbers<[1], [0], [0], [1], [0, 0, 1, 1], [], []>} : vector<8x128xf32>, vector<128x128xf32>, vector<8x128xf32> -> vector<8x128xf32>
    %c0_9 = arith.constant 0 : index
    %c0_10 = arith.constant 0 : index
    %6 = vector.load %arg4[%c0_9, %c0_10] : memref<1x128xf32, #tpu.memory_space<vmem>>, vector<1x128xf32>
    %7 = vector.broadcast %6 : vector<1x128xf32> to vector<8x128xf32>
    %8 = arith.addf %5, %7 : vector<8x128xf32>
    %c0_11 = arith.constant 0 : index
    %c0_12 = arith.constant 0 : index
    %9 = vector.load %arg1[%c0_11, %c0_12] : memref<8x128xf32, #tpu.memory_space<vmem>>, vector<8x128xf32>
    %cst_13 = arith.constant dense<0.000000e+00> : vector<8x128xf32>
    %10 = tpu.matmul %9, %0, %cst_13 {dimension_numbers = #tpu.dot_dimension_numbers<[1], [0], [0], [1], [0, 0, 1, 1], [], []>} : vector<8x128xf32>, vector<128x128xf32>, vector<8x128xf32> -> vector<8x128xf32>
    %11 = arith.addf %8, %10 : vector<8x128xf32>
    %cst_14 = arith.constant 0.000000e+00 : f32
    %12 = vector.broadcast %cst_14 : f32 to vector<8x128xf32>
    %13 = arith.maximumf %11, %12 : vector<8x128xf32>
    %cst_15 = arith.constant dense<0.000000e+00> : vector<8x128xf32>
    %14 = tpu.matmul %13, %1, %cst_15 {dimension_numbers = #tpu.dot_dimension_numbers<[1], [0], [0], [1], [0, 0, 1, 1], [], []>} : vector<8x128xf32>, vector<128x128xf32>, vector<8x128xf32> -> vector<8x128xf32>
    %15 = vector.broadcast %2 : vector<1x128xf32> to vector<8x128xf32>
    %16 = arith.addf %14, %15 : vector<8x128xf32>
    %c0_16 = arith.constant 0 : index
    %c0_17 = arith.constant 0 : index
    %17 = vector.load %arg8[%c0_16, %c0_17] : memref<8x128xf32, #tpu.memory_space<vmem>>, vector<8x128xf32>
    tpu.vector_store %arg8[%c0_16, %c0_17], %16 {strides = array<i32>} : memref<8x128xf32, #tpu.memory_space<vmem>>, vector<8x128xf32>,
    %18 = arith.addf %9, %16 : vector<8x128xf32>
    %c0_18 = arith.constant 0 : index
    %c0_19 = arith.constant 0 : index
    %c0_20 = arith.constant 0 : index
    %19 = vector.load %arg7[%c0_18, %c0_19, %c0_20] : memref<3x8x128xf32, #tpu.memory_space<vmem>>, vector<1x8x128xf32>
    %20 = vector.shape_cast %19 : vector<1x8x128xf32> to vector<8x128xf32>
    %21 = vector.shape_cast %18 : vector<8x128xf32> to vector<1x8x128xf32>
    tpu.vector_store %arg7[%c0_18, %c0_19, %c0_20], %21 {strides = array<i32>} : memref<3x8x128xf32, #tpu.memory_space<vmem>>, vector<1x8x128xf32>,
    %cst_21 = arith.constant dense<0.000000e+00> : vector<8x128xf32>
    %22 = tpu.matmul %18, %0, %cst_21 {dimension_numbers = #tpu.dot_dimension_numbers<[1], [0], [0], [1], [0, 0, 1, 1], [], []>} : vector<8x128xf32>, vector<128x128xf32>, vector<8x128xf32> -> vector<8x128xf32>
    %23 = arith.addf %8, %22 : vector<8x128xf32>
    %cst_22 = arith.constant 0.000000e+00 : f32
    %24 = vector.broadcast %cst_22 : f32 to vector<8x128xf32>
    %25 = arith.maximumf %23, %24 : vector<8x128xf32>
    %cst_23 = arith.constant dense<0.000000e+00> : vector<8x128xf32>
    %26 = tpu.matmul %25, %1, %cst_23 {dimension_numbers = #tpu.dot_dimension_numbers<[1], [0], [0], [1], [0, 0, 1, 1], [], []>} : vector<8x128xf32>, vector<128x128xf32>, vector<8x128xf32> -> vector<8x128xf32>
    %27 = vector.broadcast %2 : vector<1x128xf32> to vector<8x128xf32>
    %28 = arith.addf %26, %27 : vector<8x128xf32>
    %29 = arith.addf %18, %28 : vector<8x128xf32>
    %c1 = arith.constant 1 : index
    %c0_24 = arith.constant 0 : index
    %c0_25 = arith.constant 0 : index
    %30 = vector.load %arg7[%c1, %c0_24, %c0_25] : memref<3x8x128xf32, #tpu.memory_space<vmem>>, vector<1x8x128xf32>
    %31 = vector.shape_cast %30 : vector<1x8x128xf32> to vector<8x128xf32>
    %32 = vector.shape_cast %29 : vector<8x128xf32> to vector<1x8x128xf32>
    tpu.vector_store %arg7[%c1, %c0_24, %c0_25], %32 {strides = array<i32>} : memref<3x8x128xf32, #tpu.memory_space<vmem>>, vector<1x8x128xf32>,
    %cst_26 = arith.constant dense<0.000000e+00> : vector<8x128xf32>
    %33 = tpu.matmul %29, %0, %cst_26 {dimension_numbers = #tpu.dot_dimension_numbers<[1], [0], [0], [1], [0, 0, 1, 1], [], []>} : vector<8x128xf32>, vector<128x128xf32>, vector<8x128xf32> -> vector<8x128xf32>
    %34 = arith.addf %8, %33 : vector<8x128xf32>
    %cst_27 = arith.constant 0.000000e+00 : f32
    %35 = vector.broadcast %cst_27 : f32 to vector<8x128xf32>
    %36 = arith.maximumf %34, %35 : vector<8x128xf32>
    %cst_28 = arith.constant dense<0.000000e+00> : vector<8x128xf32>
    %37 = tpu.matmul %36, %1, %cst_28 {dimension_numbers = #tpu.dot_dimension_numbers<[1], [0], [0], [1], [0, 0, 1, 1], [], []>} : vector<8x128xf32>, vector<128x128xf32>, vector<8x128xf32> -> vector<8x128xf32>
    %38 = vector.broadcast %2 : vector<1x128xf32> to vector<8x128xf32>
    %39 = arith.addf %37, %38 : vector<8x128xf32>
    %40 = arith.addf %29, %39 : vector<8x128xf32>
    %c2 = arith.constant 2 : index
    %c0_29 = arith.constant 0 : index
    %c0_30 = arith.constant 0 : index
    %41 = vector.load %arg7[%c2, %c0_29, %c0_30] : memref<3x8x128xf32, #tpu.memory_space<vmem>>, vector<1x8x128xf32>
    %42 = vector.shape_cast %41 : vector<1x8x128xf32> to vector<8x128xf32>
    %43 = vector.shape_cast %40 : vector<8x128xf32> to vector<1x8x128xf32>
    tpu.vector_store %arg7[%c2, %c0_29, %c0_30], %43 {strides = array<i32>} : memref<3x8x128xf32, #tpu.memory_space<vmem>>, vector<1x8x128xf32>,
    return
  }
}

</mosaic_0001>

<bundles_post_ra>
// kernel: tpu_custom_call.1
= control target key start
LH: loop header
LB: loop body
LE: loop exit
PB: predicated region body
PF: predicated region fallthrough
CT: control target
= control target key end

     0   :  { %14 = vsyncpa [#allocation3], 0  ;;  %s1729_s0 = inlined_call_operand.hbm [shape: f32[8,128], index: 0, kind: input, shape index: {}]   ;;  %s1730_s1 = inlined_call_operand.hbm [shape: f32[8,128], index: 1, kind: input, shape index: {}]   ;;  %s1731_s2 = inlined_call_operand.hbm [shape: f32[128,128], index: 2, kind: input, shape index: {}]   ;;  %s1732_s3 = inlined_call_operand.hbm [shape: f32[128,128], index: 3, kind: input, shape index: {}]   ;;  %s1733_s4 = inlined_call_operand.vmem [shape: f32[1,128], index: 4, kind: input, shape index: {}]   ;;  %s1734_s5 = inlined_call_operand.hbm [shape: f32[128,128], index: 5, kind: input, shape index: {}]   ;;  %s1735_s6 = inlined_call_operand.vmem [shape: f32[1,128], index: 6, kind: input, shape index: {}]   ;;  %s1736_s7 = inlined_call_operand.hbm [shape: f32[3,8,128], index: 7, kind: output, shape index: {0}]   ;;  %s1737_s8 = inlined_call_operand.hbm [shape: f32[8,128], index: 8, kind: output, shape index: {1}]  }
   0x1   :  { %15 = vsyncpa [#allocation6], 0 }
   0x2   :  { %16 = vsyncpa [#allocation9], 0 }
   0x3   :  { %17 = vsyncpa [#allocation4], 0 }
   0x4   :  { %18 = vsyncpa [#allocation13], 0  ;;  %s1406_s27 = smov [#allocation5]   ;;  %s1242_s9 = scalar_lea.hbm %s1730_s1, 128 }
   0x5   :  { %s35_s28 = sshll.u32 %s1406_s27, 4  ;;  %p1243_p0 = scmp.ne.s32.totalorder %s1730_s1, %s1242_s9  ;;  %s36_s28 = int_to_ptr.vmem [resolvable:$true] %s35_s28 }
   0x6   :  { %p1246_p1 = scmp.lt.u32.totalorder %s1242_s9, %s1730_s1 }
   0x8   :  { %p1248_p2 = pnand %p1246_p1, %p1243_p0 }
   0xa   :  { %1251 = shalt.err (!%p1248_p2)
}
   0xb   :  { %s1252_s14 = scalar_lea.vmem %s36_s28, 128  ;;  %p1257_p4 = scmp.lt.s32.totalorder %s36_s28, %s36_s28 }
   0xc   :  { %p1253_p3 = scmp.ne.s32.totalorder %s36_s28, %s1252_s14  ;;  %p1258_p5 = scmp.lt.s32.totalorder %s1252_s14, %s1252_s14 }
   0xe   :  { %p1259_p6 = por %p1258_p5, %p1257_p4 }
  0x10   :  { %p1260_p7 = pnand %p1259_p6, %p1253_p3 }
  0x12   :  { %1263 = shalt.err (!%p1260_p7)
}
  0x13   :  { %38 = dma.hbm_to_vmem [thread:$0]  %s1730_s1, 128, %s36_s28, [#allocation6]  }
  0x14   :  { %s1407_s17 = smov [#allocation8]   ;;  %s1408_s19 = smov [#allocation2]  }
  0x15   :  { %s56_s18 = sshll.u32 %s1407_s17, 4  ;;  %s25_s20 = sshll.u32 %s1408_s19, 4  ;;  %s57_s18 = int_to_ptr.vmem [resolvable:$true] %s56_s18  ;;  %s26_s20 = int_to_ptr.vmem [resolvable:$true] %s25_s20 }
  0x16   :  { %s1264_s23 = scalar_lea.hbm %s1732_s3, 2048 }
  0x17   :  { %p1265_p8 = scmp.ne.s32.totalorder %s1732_s3, %s1264_s23  ;;  %p1268_p9 = scmp.lt.u32.totalorder %s1264_s23, %s1732_s3 }
  0x19   :  { %p1270_p10 = pnand %p1268_p9, %p1265_p8 }
  0x1b   :  { %1273 = shalt.err (!%p1270_p10)
}
  0x1c   :  { %s1274_s1 = scalar_lea.vmem %s57_s18, 2048  ;;  %p1279_p12 = scmp.lt.s32.totalorder %s57_s18, %s57_s18 }
  0x1d   :  { %p1275_p11 = scmp.ne.s32.totalorder %s57_s18, %s1274_s1  ;;  %p1280_p13 = scmp.lt.s32.totalorder %s1274_s1, %s1274_s1 }
  0x1f   :  { %p1281_p0 = por %p1280_p13, %p1279_p12 }
  0x21   :  { %p1282_p1 = pnand %p1281_p0, %p1275_p11 }
  0x23   :  { %1285 = shalt.err (!%p1282_p1)
}
  0x24   :  { %s1409_s28 = smov 128   ;;  %s1410_s29 = smov 8  }
  0x25   :  { %62 = dma.hbm_to_vmem [thread:$0]  %s1732_s3, 2048, %s57_s18, [#allocation9], %s1409_s28, %s1409_s28, %s1410_s29  }
  0x26   :  { %s1286_s12 = scalar_lea.hbm %s1729_s0, 128 }
  0x27   :  { %p1287_p2 = scmp.ne.s32.totalorder %s1729_s0, %s1286_s12  ;;  %p1290_p3 = scmp.lt.u32.totalorder %s1286_s12, %s1729_s0 }
  0x29   :  { %p1292_p4 = pnand %p1290_p3, %p1287_p2 }
  0x2b   :  { %1295 = shalt.err (!%p1292_p4)
}
  0x2c   :  { %s1296_s17 = scalar_lea.vmem %s26_s20, 128  ;;  %p1301_p6 = scmp.lt.s32.totalorder %s26_s20, %s26_s20 }
  0x2d   :  { %p1297_p5 = scmp.ne.s32.totalorder %s26_s20, %s1296_s17  ;;  %p1302_p7 = scmp.lt.s32.totalorder %s1296_s17, %s1296_s17 }
  0x2f   :  { %p1303_p8 = por %p1302_p7, %p1301_p6 }
  0x31   :  { %p1304_p9 = pnand %p1303_p8, %p1297_p5 }
  0x33   :  { %1307 = shalt.err (!%p1304_p9)
}
  0x34   :  { %28 = dma.hbm_to_vmem [thread:$0]  %s1729_s0, 128, %s26_s20, [#allocation3]  }
  0x35   :  { %s1411_s19 = smov [#allocation7]   ;;  %s1412_s22 = smov [#allocation10]  }
  0x36   :  { %s44_s21 = sshll.u32 %s1411_s19, 4  ;;  %s70_s23 = sshll.u32 %s1412_s22, 4  ;;  %s45_s21 = int_to_ptr.vmem [resolvable:$true] %s44_s21  ;;  %s71_s23 = int_to_ptr.vmem [resolvable:$true] %s70_s23 }
  0x37   :  { %s1308_s26 = scalar_lea.hbm %s1731_s2, 2048 }
  0x38   :  { %p1309_p10 = scmp.ne.s32.totalorder %s1731_s2, %s1308_s26  ;;  %p1312_p11 = scmp.lt.u32.totalorder %s1308_s26, %s1731_s2 }
  0x3a   :  { %p1314_p12 = pnand %p1312_p11, %p1309_p10 }
  0x3c   :  { %1317 = shalt.err (!%p1314_p12)
}
  0x3d   :  { %s1318_s0 = scalar_lea.vmem %s45_s21, 2048  ;;  %p1323_p0 = scmp.lt.s32.totalorder %s45_s21, %s45_s21 }
  0x3e   :  { %p1319_p13 = scmp.ne.s32.totalorder %s45_s21, %s1318_s0  ;;  %p1324_p1 = scmp.lt.s32.totalorder %s1318_s0, %s1318_s0 }
  0x40   :  { %p1325_p2 = por %p1324_p1, %p1323_p0 }
  0x42   :  { %p1326_p3 = pnand %p1325_p2, %p1319_p13 }
  0x44   :  { %1329 = shalt.err (!%p1326_p3)
}
  0x45   :  { %50 = dma.hbm_to_vmem [thread:$0]  %s1731_s2, 2048, %s45_s21, [#allocation6], %s1409_s28, %s1409_s28, %s1410_s29  }
  0x46   :  { %s1330_s13 = scalar_lea.hbm %s1734_s5, 2048 }
  0x47   :  { %p1331_p4 = scmp.ne.s32.totalorder %s1734_s5, %s1330_s13  ;;  %p1334_p5 = scmp.lt.u32.totalorder %s1330_s13, %s1734_s5 }
  0x49   :  { %p1336_p6 = pnand %p1334_p5, %p1331_p4 }
  0x4b   :  { %1339 = shalt.err (!%p1336_p6)
}
  0x4c   :  { %s1340_s3 = scalar_lea.vmem %s71_s23, 2048  ;;  %p1345_p8 = scmp.lt.s32.totalorder %s71_s23, %s71_s23 }
  0x4d   :  { %p1341_p7 = scmp.ne.s32.totalorder %s71_s23, %s1340_s3  ;;  %p1346_p9 = scmp.lt.s32.totalorder %s1340_s3, %s1340_s3 }
  0x4f   :  { %p1347_p10 = por %p1346_p9, %p1345_p8 }
  0x51   :  { %p1348_p11 = pnand %p1347_p10, %p1341_p7 }
  0x53   :  { %1351 = shalt.err (!%p1348_p11)
}
  0x54   :  { %76 = dma.hbm_to_vmem [thread:$0]  %s1734_s5, 2048, %s71_s23, [#allocation9], %s1409_s28, %s1409_s28, %s1410_s29  }
  0x55   :  { %1396 = dma.done.wait [#allocation3], 128  }
  0x56   :  { %1397 = vsyncadd [#allocation3], 4294967168 }
  0x57   :  { %1398 = dma.done.wait [#allocation6], 2176  }
  0x58   :  { %1399 = vsyncadd [#allocation6], 4294965120 }
  0x59   :  { %1400 = dma.done.wait [#allocation9], 4096  }
  0x5a   :  { %1401 = vsyncadd [#allocation9], 4294963200  ;;  %v1413_v0 = vmov 0.0|0.0   ;;  %vm1414_vm0 = vmmov 0   ;;  %v1415_v1 = vmov 0.0   ;;  %v128_v2 = vld [vmem:[#allocation7] sm:$0xff] }
  0x5b   :  { %1062 = vmatprep.subr.bf16.mxu0 %v1413_v0  ;;  %1086 = vmatprep.subr.bf16.mxu1 %v1413_v0  ;;  %v129_v3 = vld [vmem:[#allocation7 + $0x8] sm:$0xff]  ;;  %v94_v4 = vld [vmem:[#allocation8] sm:$0xff]  ;;  %v130_v7 = vld [vmem:[#allocation7 + $0x10] sm:$0xff] }
  0x5c   :  { %849 = vmatprep.mubr.msk.f32.mxu0 %vm1414_vm0, %v1415_v1  ;;  %884 = vmatprep.mubr.msk.f32.mxu1 %vm1414_vm0, %v1415_v1  ;;  %v1063_v5 = vpack.c.bf16 %v129_v3, %v128_v2  ;;  %v95_v6 = vld [vmem:[#allocation8 + $0x8] sm:$0xff]  ;;  %v131_v8 = vld [vmem:[#allocation7 + $0x18] sm:$0xff]  ;;  %v96_v10 = vld [vmem:[#allocation8 + $0x10] sm:$0xff] }
  0x5d   :  { %v1538_v9 = vpack.c.bf16 %v95_v6, %v94_v4  ;;  %v97_v11 = vld [vmem:[#allocation8 + $0x18] sm:$0xff]  ;;  %v1066_v12 = vpack.c.bf16 %v131_v8, %v130_v7  ;;  %v132_v14 = vld [vmem:[#allocation7 + $0x20] sm:$0xff]  ;;  %v133_v15 = vld [vmem:[#allocation7 + $0x28] sm:$0xff] }
  0x5e   :  { %1064 = vmatpush3.bf16.msra.mxu0 %v1063_v5  ;;  %v1542_v13 = vpack.c.bf16 %v97_v11, %v96_v10  ;;  %v98_v16 = vld [vmem:[#allocation8 + $0x20] sm:$0xff]  ;;  %v99_v17 = vld [vmem:[#allocation8 + $0x28] sm:$0xff]  ;;  %v1069_v18 = vpack.c.bf16 %v133_v15, %v132_v14  ;;  %v134_v20 = vld [vmem:[#allocation7 + $0x30] sm:$0xff] }
  0x5f   :  { %1088 = vmatpush3.bf16.msra.mxu1 %v1538_v9  ;;  %1065 = vmatprep.subr.bf16.mxu0 %v1413_v0  ;;  %v1547_v19 = vpack.c.bf16 %v99_v17, %v98_v16  ;;  %v135_v21 = vld [vmem:[#allocation7 + $0x38] sm:$0xff]  ;;  %v100_v22 = vld [vmem:[#allocation8 + $0x30] sm:$0xff]  ;;  %v136_v26 = vld [vmem:[#allocation7 + $0x40] sm:$0xff] }
  0x60   :  { %1089 = vmatprep.subr.bf16.mxu1 %v1413_v0  ;;  %v101_v23 = vld [vmem:[#allocation8 + $0x38] sm:$0xff]  ;;  %v1072_v24 = vpack.c.bf16 %v135_v21, %v134_v20  ;;  %v137_v27 = vld [vmem:[#allocation7 + $0x48] sm:$0xff]  ;;  %v102_v28 = vld [vmem:[#allocation8 + $0x40] sm:$0xff] }
  0x61   :  { %v1552_v25 = vpack.c.bf16 %v101_v23, %v100_v22  ;;  %v103_v29 = vld [vmem:[#allocation8 + $0x48] sm:$0xff]  ;;  %v1075_v30 = vpack.c.bf16 %v137_v27, %v136_v26  ;;  %v138_v32 = vld [vmem:[#allocation7 + $0x50] sm:$0xff]  ;;  %v139_v33 = vld [vmem:[#allocation7 + $0x58] sm:$0xff] }
  0x62   :  { %1067 = vmatpush3.bf16.msra.mxu0 %v1066_v12  ;;  %v1557_v31 = vpack.c.bf16 %v103_v29, %v102_v28  ;;  %v104_v34 = vld [vmem:[#allocation8 + $0x50] sm:$0xff]  ;;  %v105_v35 = vld [vmem:[#allocation8 + $0x58] sm:$0xff]  ;;  %v1078_v36 = vpack.c.bf16 %v139_v33, %v138_v32  ;;  %v140_v38 = vld [vmem:[#allocation7 + $0x60] sm:$0xff] }
  0x63   :  { %1091 = vmatpush3.bf16.msra.mxu1 %v1542_v13  ;;  %1068 = vmatprep.subr.bf16.mxu0 %v1413_v0  ;;  %v1562_v37 = vpack.c.bf16 %v105_v35, %v104_v34  ;;  %v141_v39 = vld [vmem:[#allocation7 + $0x68] sm:$0xff]  ;;  %v106_v40 = vld [vmem:[#allocation8 + $0x60] sm:$0xff]  ;;  %v142_v44 = vld [vmem:[#allocation7 + $0x70] sm:$0xff] }
  0x64   :  { %1092 = vmatprep.subr.bf16.mxu1 %v1413_v0  ;;  %v107_v41 = vld [vmem:[#allocation8 + $0x68] sm:$0xff]  ;;  %v1081_v42 = vpack.c.bf16 %v141_v39, %v140_v38  ;;  %v143_v45 = vld [vmem:[#allocation7 + $0x78] sm:$0xff]  ;;  %v108_v46 = vld [vmem:[#allocation8 + $0x70] sm:$0xff] }
  0x65   :  { %v1567_v43 = vpack.c.bf16 %v107_v41, %v106_v40  ;;  %v109_v47 = vld [vmem:[#allocation8 + $0x78] sm:$0xff]  ;;  %v1084_v48 = vpack.c.bf16 %v143_v45, %v142_v44  ;;  %v110_v50 = vld [vmem:[#allocation10] sm:$0xff]  ;;  %v111_v51 = vld [vmem:[#allocation10 + $0x8] sm:$0xff] }
  0x66   :  { %1070 = vmatpush3.bf16.msra.mxu0 %v1069_v18  ;;  %v1572_v49 = vpack.c.bf16 %v109_v47, %v108_v46  ;;  %v127_v52 = vld [vmem:[#allocation2] sm:$0xff]  ;;  %v1575_v53 = vpack.c.bf16 %v111_v51, %v110_v50  ;;  %v1578_v54 = vld [vmem:[#allocation5] sm:$0xff]  ;;  %v114_v58 = vld [vmem:[#allocation10 + $0x20] sm:$0xff] }
  0x67   :  { %1094 = vmatpush3.bf16.msra.mxu1 %v1547_v19  ;;  %1071 = vmatprep.subr.bf16.mxu0 %v1413_v0  ;;  %v112_v55 = vld [vmem:[#allocation10 + $0x10] sm:$0xff]  ;;  %v113_v56 = vld [vmem:[#allocation10 + $0x18] sm:$0xff]  ;;  %v115_v59 = vld [vmem:[#allocation10 + $0x28] sm:$0xff] }
  0x68   :  { %1095 = vmatprep.subr.bf16.mxu1 %v1413_v0  ;;  %v1584_v57 = vpack.c.bf16 %v113_v56, %v112_v55  ;;  %v1594_v60 = vpack.c.bf16 %v115_v59, %v114_v58  ;;  %v116_v61 = vld [vmem:[#allocation10 + $0x30] sm:$0xff]  ;;  %v117_v62 = vld [vmem:[#allocation10 + $0x38] sm:$0xff]  ;;  %v118_v2 = vld [vmem:[#allocation10 + $0x40] sm:$0xff] }
  0x69   :  { %v1600_v63 = vpack.c.bf16 %v117_v62, %v116_v61  ;;  %v119_v3 = vld [vmem:[#allocation10 + $0x48] sm:$0xff]  ;;  %v120_v5 = vld [vmem:[#allocation10 + $0x50] sm:$0xff]  ;;  %v121_v6 = vld [vmem:[#allocation10 + $0x58] sm:$0xff] }
  0x6a   :  { %1073 = vmatpush3.bf16.msra.mxu0 %v1072_v24  ;;  %v1606_v4 = vpack.c.bf16 %v119_v3, %v118_v2  ;;  %v1612_v7 = vpack.c.bf16 %v121_v6, %v120_v5  ;;  %v122_v8 = vld [vmem:[#allocation10 + $0x60] sm:$0xff]  ;;  %v123_v10 = vld [vmem:[#allocation10 + $0x68] sm:$0xff]  ;;  %v124_v12 = vld [vmem:[#allocation10 + $0x70] sm:$0xff] }
  0x6b   :  { %1097 = vmatpush3.bf16.msra.mxu1 %v1552_v25  ;;  %1074 = vmatprep.subr.bf16.mxu0 %v1413_v0  ;;  %v1625_v11 = vpack.c.bf16 %v123_v10, %v122_v8  ;;  %v125_v14 = vld [vmem:[#allocation10 + $0x78] sm:$0xff]  ;;  %v696_v16 = vld [vmem:[%s1733_s4] ss:$0 sm:$0xff] }
  0x6c   :  { %1098 = vmatprep.subr.bf16.mxu1 %v1413_v0  ;;  %v1629_v15 = vpack.c.bf16 %v125_v14, %v124_v12  ;;  %v1660_v26 = vld [vmem:[%s1735_s6] ss:$0 sm:$0xff]  ;;  %s1416_s6 = smov [#allocation12]  }
  0x6d   :  { %s681_s22 = sshll.u32 %s1416_s6, 4  ;;  %s682_s22 = int_to_ptr.vmem [resolvable:$true] %s681_s22 }
  0x6e   :  { %1076 = vmatpush3.bf16.msra.mxu0 %v1075_v30  ;;  %s1352_s23 = scalar_lea.vmem %s682_s22, 128  ;;  %p1357_p13 = scmp.lt.s32.totalorder %s682_s22, %s682_s22 }
  0x6f   :  { %1100 = vmatpush3.bf16.msra.mxu1 %v1557_v31  ;;  %1077 = vmatprep.subr.bf16.mxu0 %v1413_v0  ;;  %p1353_p12 = scmp.ne.s32.totalorder %s682_s22, %s1352_s23  ;;  %p1358_p0 = scmp.lt.s32.totalorder %s1352_s23, %s1352_s23 }
  0x70   :  { %1101 = vmatprep.subr.bf16.mxu1 %v1413_v0 }
  0x71   :  { %p1359_p1 = por %p1358_p0, %p1357_p13 }
  0x72   :  { %1079 = vmatpush3.bf16.msra.mxu0 %v1078_v36 }
  0x73   :  { %1103 = vmatpush3.bf16.msra.mxu1 %v1562_v37  ;;  %1080 = vmatprep.subr.bf16.mxu0 %v1413_v0  ;;  %p1360_p2 = pnand %p1359_p1, %p1353_p12 }
  0x74   :  { %1104 = vmatprep.subr.bf16.mxu1 %v1413_v0 }
  0x76   :  { %1082 = vmatpush3.bf16.msra.mxu0 %v1081_v42 }
  0x77   :  { %1106 = vmatpush3.bf16.msra.mxu1 %v1567_v43  ;;  %1083 = vmatprep.subr.bf16.mxu0 %v1413_v0 }
  0x78   :  { %1107 = vmatprep.subr.bf16.mxu1 %v1413_v0 }
  0x7a   :  { %1085 = vmatpush3.bf16.msra.mxu0 %v1084_v48 }
  0x7b   :  { %1109 = vmatpush3.bf16.msra.mxu1 %v1572_v49  ;;  %1110 = vmatprep.subr.bf16.mxu0 %v1413_v0 }
  0x7c   :  { %1134 = vmatprep.subr.bf16.mxu1 %v1413_v0 }
  0x7d   :  { %850 = vmatmul.mubr.f32.vlgmr.msra.gmra.mrb[0].mxu0 %v127_v52 }
  0x7e   :  { %885 = vmatmul.mubr.f32.vlgmr.msra.gmra.mrb[0].mxu1 %v1578_v54  ;;  %1112 = vmatpush3.bf16.msra.mxu0 %v1575_v53 }
  0x7f   :  { %1113 = vmatprep.subr.bf16.mxu0 %v1413_v0  ;;  %919 = vmatprep.mubr.msk.f32.mxu0 %vm1414_vm0, %v1415_v1 }
  0x80   :  { %1136 = vmatpush3.bf16.msra.mxu1 %v1538_v9  ;;  %954 = vmatprep.mubr.msk.f32.mxu1 %vm1414_vm0, %v1415_v1 }
  0x81   :  { %1137 = vmatprep.subr.bf16.mxu1 %v1413_v0 }
  0x82   :  { %1115 = vmatpush3.bf16.msra.mxu0 %v1584_v57 }
  0x83   :  { %1116 = vmatprep.subr.bf16.mxu0 %v1413_v0 }
  0x84   :  { %1139 = vmatpush3.bf16.msra.mxu1 %v1542_v13 }
  0x85   :  { %1140 = vmatprep.subr.bf16.mxu1 %v1413_v0 }
  0x86   :  { %1118 = vmatpush3.bf16.msra.mxu0 %v1594_v60 }
  0x87   :  { %1119 = vmatprep.subr.bf16.mxu0 %v1413_v0 }
  0x88   :  { %1142 = vmatpush3.bf16.msra.mxu1 %v1547_v19 }
  0x89   :  { %1143 = vmatprep.subr.bf16.mxu1 %v1413_v0 }
  0x8a   :  { %1121 = vmatpush3.bf16.msra.mxu0 %v1600_v63 }
  0x8b   :  { %1122 = vmatprep.subr.bf16.mxu0 %v1413_v0 }
  0x8c   :  { %1145 = vmatpush3.bf16.msra.mxu1 %v1552_v25 }
  0x8d   :  { %1146 = vmatprep.subr.bf16.mxu1 %v1413_v0 }
  0x8e   :  { %1124 = vmatpush3.bf16.msra.mxu0 %v1606_v4 }
  0x8f   :  { %1125 = vmatprep.subr.bf16.mxu0 %v1413_v0 }
  0x90   :  { %1148 = vmatpush3.bf16.msra.mxu1 %v1557_v31 }
  0x91   :  { %1149 = vmatprep.subr.bf16.mxu1 %v1413_v0 }
  0x92   :  { %1127 = vmatpush3.bf16.msra.mxu0 %v1612_v7 }
  0x93   :  { %1128 = vmatprep.subr.bf16.mxu0 %v1413_v0 }
  0x94   :  { %1151 = vmatpush3.bf16.msra.mxu1 %v1562_v37 }
  0x95   :  { %1152 = vmatprep.subr.bf16.mxu1 %v1413_v0 }
  0x96   :  { %1130 = vmatpush3.bf16.msra.mxu0 %v1625_v11 }
  0x97   :  { %1131 = vmatprep.subr.bf16.mxu0 %v1413_v0 }
  0x98   :  { %1154 = vmatpush3.bf16.msra.mxu1 %v1567_v43 }
  0x99   :  { %1155 = vmatprep.subr.bf16.mxu1 %v1413_v0 }
  0x9a   :  { %1133 = vmatpush3.bf16.msra.mxu0 %v1629_v15 }
  0x9b   :  { %1158 = vmatprep.subr.bf16.mxu0 %v1413_v0 }
  0x9c   :  { %1157 = vmatpush3.bf16.msra.mxu1 %v1572_v49 }
  0x9d   :  { %1182 = vmatprep.subr.bf16.mxu1 %v1413_v0 }
 0x150   :  { %v217_v17 = vpop.f32.mrb[0].mxu0 }
 0x151   :  { %v1636_v18 = vadd.f32 %v696_v16, %v217_v17  ;;  %v851_v20 = vpop.f32.mrb[1].mxu0  ;;  %v288_v21 = vpop.f32.mrb[0].mxu1 }
 0x152   :  { %v886_v22 = vpop.f32.mrb[1].mxu1 }
 0x153   :  { %v292_v23 = vadd.f32 %v288_v21, %v1636_v18 }
 0x155   :  { %v293_v24 = vmax.f32 %v292_v23, 0.0 }
 0x157   :  { %920 = vmatmul.mubr.f32.vlgmr.msra.gmra.mrb[2].mxu0 %v293_v24 }
 0x158   :  { %1160 = vmatpush3.bf16.msra.mxu0 %v1575_v53  ;;  %989 = vmatprep.mubr.msk.f32.mxu0 %vm1414_vm0, %v1415_v1 }
 0x159   :  { %1161 = vmatprep.subr.bf16.mxu0 %v1413_v0 }
 0x15c   :  { %1163 = vmatpush3.bf16.msra.mxu0 %v1584_v57 }
 0x15d   :  { %1164 = vmatprep.subr.bf16.mxu0 %v1413_v0 }
 0x160   :  { %1166 = vmatpush3.bf16.msra.mxu0 %v1594_v60 }
 0x161   :  { %1167 = vmatprep.subr.bf16.mxu0 %v1413_v0 }
 0x164   :  { %1169 = vmatpush3.bf16.msra.mxu0 %v1600_v63 }
 0x165   :  { %1170 = vmatprep.subr.bf16.mxu0 %v1413_v0 }
 0x168   :  { %1172 = vmatpush3.bf16.msra.mxu0 %v1606_v4 }
 0x169   :  { %1173 = vmatprep.subr.bf16.mxu0 %v1413_v0 }
 0x16c   :  { %1175 = vmatpush3.bf16.msra.mxu0 %v1612_v7 }
 0x16d   :  { %1176 = vmatprep.subr.bf16.mxu0 %v1413_v0 }
 0x170   :  { %1178 = vmatpush3.bf16.msra.mxu0 %v1625_v11 }
 0x171   :  { %1179 = vmatprep.subr.bf16.mxu0 %v1413_v0 }
 0x174   :  { %1181 = vmatpush3.bf16.msra.mxu0 %v1629_v15 }
 0x175   :  { %1206 = vmatprep.subr.bf16.mxu0 %v1413_v0 }
 0x22a   :  { %v366_v27 = vpop.f32.mrb[2].mxu0 }
 0x22b   :  { %v367_v28 = vadd.f32 %v1660_v26, %v366_v27  ;;  %v921_v29 = vpop.f32.mrb[3].mxu0 }
 0x22d   :  { %v371_v30 = vadd.f32 %v367_v28, %v1578_v54  ;;  %370 = vst [vmem:[#allocation12] sm:$0xff] %v367_v28 }
 0x22f   :  { %372 = vst [vmem:[#allocation11] sm:$0xff] %v371_v30  ;;  %955 = vmatmul.mubr.f32.vlgmr.msra.gmra.mrb[2].mxu1 %v371_v30 }
 0x230   :  { %1184 = vmatpush3.bf16.msra.mxu1 %v1538_v9  ;;  %1024 = vmatprep.mubr.msk.f32.mxu1 %vm1414_vm0, %v1415_v1 }
 0x231   :  { %1185 = vmatprep.subr.bf16.mxu1 %v1413_v0 }
 0x234   :  { %1187 = vmatpush3.bf16.msra.mxu1 %v1542_v13 }
 0x235   :  { %1188 = vmatprep.subr.bf16.mxu1 %v1413_v0 }
 0x238   :  { %1190 = vmatpush3.bf16.msra.mxu1 %v1547_v19 }
 0x239   :  { %1191 = vmatprep.subr.bf16.mxu1 %v1413_v0 }
 0x23c   :  { %1193 = vmatpush3.bf16.msra.mxu1 %v1552_v25 }
 0x23d   :  { %1194 = vmatprep.subr.bf16.mxu1 %v1413_v0 }
 0x240   :  { %1196 = vmatpush3.bf16.msra.mxu1 %v1557_v31 }
 0x241   :  { %1197 = vmatprep.subr.bf16.mxu1 %v1413_v0 }
 0x244   :  { %1199 = vmatpush3.bf16.msra.mxu1 %v1562_v37 }
 0x245   :  { %1200 = vmatprep.subr.bf16.mxu1 %v1413_v0 }
 0x248   :  { %1202 = vmatpush3.bf16.msra.mxu1 %v1567_v43 }
 0x249   :  { %1203 = vmatprep.subr.bf16.mxu1 %v1413_v0 }
 0x24c   :  { %1205 = vmatpush3.bf16.msra.mxu1 %v1572_v49 }
 0x302   :  { %v439_v9 = vpop.f32.mrb[2].mxu1 }
 0x303   :  { %v443_v13 = vadd.f32 %v439_v9, %v1636_v18  ;;  %v956_v19 = vpop.f32.mrb[3].mxu1 }
 0x305   :  { %v444_v25 = vmax.f32 %v443_v13, 0.0 }
 0x307   :  { %990 = vmatmul.mubr.f32.vlgmr.msra.gmra.mrb[4].mxu0 %v444_v25 }
 0x308   :  { %1208 = vmatpush3.bf16.msra.mxu0 %v1575_v53  ;;  %1059 = vmatprep.mubr.msk.f32.mxu0 %vm1414_vm0, %v1415_v1 }
 0x309   :  { %1209 = vmatprep.subr.bf16.mxu0 %v1413_v0 }
 0x30c   :  { %1211 = vmatpush3.bf16.msra.mxu0 %v1584_v57 }
 0x30d   :  { %1212 = vmatprep.subr.bf16.mxu0 %v1413_v0 }
 0x310   :  { %1214 = vmatpush3.bf16.msra.mxu0 %v1594_v60 }
 0x311   :  { %1215 = vmatprep.subr.bf16.mxu0 %v1413_v0 }
 0x314   :  { %1217 = vmatpush3.bf16.msra.mxu0 %v1600_v63 }
 0x315   :  { %1218 = vmatprep.subr.bf16.mxu0 %v1413_v0 }
 0x318   :  { %1220 = vmatpush3.bf16.msra.mxu0 %v1606_v4 }
 0x319   :  { %1221 = vmatprep.subr.bf16.mxu0 %v1413_v0 }
 0x31c   :  { %1223 = vmatpush3.bf16.msra.mxu0 %v1612_v7 }
 0x31d   :  { %1224 = vmatprep.subr.bf16.mxu0 %v1413_v0 }
 0x320   :  { %1226 = vmatpush3.bf16.msra.mxu0 %v1625_v11 }
 0x321   :  { %1227 = vmatprep.subr.bf16.mxu0 %v1413_v0 }
 0x324   :  { %1229 = vmatpush3.bf16.msra.mxu0 %v1629_v15 }
 0x3da   :  { %v511_v1 = vpop.f32.mrb[4].mxu0 }
 0x3db   :  { %v512_v31 = vadd.f32 %v1660_v26, %v511_v1  ;;  %v991_v32 = vpop.f32.mrb[5].mxu0 }
 0x3dd   :  { %v515_v33 = vadd.f32 %v512_v31, %v371_v30 }
 0x3df   :  { %517 = vst [vmem:[#allocation11 + $0x8] sm:$0xff] %v515_v33  ;;  %1025 = vmatmul.mubr.f32.vlgmr.msra.gmra.mrb[4].mxu1 %v515_v33 }
 0x4b2   :  { %v584_v34 = vpop.f32.mrb[4].mxu1 }
 0x4b3   :  { %v588_v35 = vadd.f32 %v584_v34, %v1636_v18  ;;  %v1026_v36 = vpop.f32.mrb[5].mxu1 }
 0x4b5   :  { %v589_v37 = vmax.f32 %v588_v35, 0.0 }
 0x4b7   :  { %1060 = vmatmul.mubr.f32.vlgmr.msra.gmra.mrb[6].mxu0 %v589_v37 }
 0x4b8   :  { %1363 = shalt.err (!%p1360_p2)
}
 0x4b9   :  { %s1364_s26 = scalar_lea.hbm %s1737_s8, 128 }
 0x4ba   :  { %p1365_p3 = scmp.ne.s32.totalorder %s1737_s8, %s1364_s26  ;;  %p1368_p4 = scmp.lt.u32.totalorder %s1364_s26, %s1737_s8 }
 0x4bc   :  { %p1370_p5 = pnand %p1368_p4, %p1365_p3 }
 0x4be   :  { %1373 = shalt.err (!%p1370_p5)
}
 0x4bf   :  { %684 = dma.vmem_to_hbm [thread:$0]  %s682_s22, 128, %s1737_s8, [#allocation13]  }
 0x4c0   :  { %s1417_s10 = smov [#allocation11]  }
 0x4c1   :  { %s668_s11 = sshll.u32 %s1417_s10, 4  ;;  %s669_s11 = int_to_ptr.vmem [resolvable:$true] %s668_s11 }
 0x4c2   :  { %s1374_s12 = scalar_lea.vmem %s669_s11, 384  ;;  %p1379_p7 = scmp.lt.s32.totalorder %s669_s11, %s669_s11 }
 0x4c3   :  { %p1375_p6 = scmp.ne.s32.totalorder %s669_s11, %s1374_s12  ;;  %p1380_p8 = scmp.lt.s32.totalorder %s1374_s12, %s1374_s12 }
 0x4c5   :  { %p1381_p9 = por %p1380_p8, %p1379_p7 }
 0x4c7   :  { %p1382_p10 = pnand %p1381_p9, %p1375_p6 }
 0x58a   :  { %v656_v0 = vpop.f32.mrb[6].mxu0 }
 0x58b   :  { %v657_v38 = vadd.f32 %v1660_v26, %v656_v0  ;;  %v1061_v39 = vpop.f32.mrb[7].mxu0 }
 0x58d   :  { %v660_v40 = vadd.f32 %v657_v38, %v515_v33 }
 0x58f   :  { %662 = vst [vmem:[#allocation11 + $0x10] sm:$0xff] %v660_v40 }
 0x590   :  { %1385 = shalt.err (!%p1382_p10)
}
 0x591   :  { %s1386_s8 = scalar_lea.hbm %s1736_s7, 384 }
 0x592   :  { %p1387_p11 = scmp.ne.s32.totalorder %s1736_s7, %s1386_s8  ;;  %p1390_p12 = scmp.lt.u32.totalorder %s1386_s8, %s1736_s7 }
 0x594   :  { %p1392_p13 = pnand %p1390_p12, %p1387_p11 }
 0x596   :  { %1395 = shalt.err (!%p1392_p13)
}
 0x597   :  { %674 = dma.vmem_to_hbm [thread:$0]  %s669_s11, 384, %s1736_s7, [#allocation4], %s1409_s28, %s1409_s28, %s1410_s29  }
 0x598   :  { %1402 = dma.done.wait [#allocation4], 384  }
 0x599   :  { %1403 = vsyncadd [#allocation4], 4294966912 }
 0x59a   :  { %1404 = dma.done.wait [#allocation13], 128  }
 0x59b   :  { %1405 = vsyncadd [#allocation13], 4294967168 }
 0x59c   :  { %691 = vsyncpa [#allocation3], 1 }
 0x59d   :  { %692 = vsyncpa [#allocation6], 1 }
 0x59e   :  { %693 = vsyncpa [#allocation9], 1 }
 0x59f   :  { %694 = vsyncpa [#allocation4], 1 }
 0x5a0   :  { %695 = vsyncpa [#allocation13], 1 }

</bundles_post_ra>
